<compile_context>
chip_gen: v7x
topology: tpu7x:2x2x1
jax: 0.10.0
libtpu: 0.0.40
codegen_flags: <defaults>
</compile_context>

<pallas_src>
import functools

import jax
import jax.numpy as jnp
from jax import lax
from jax.experimental import pallas as pl
from jax.experimental.pallas import tpu as pltpu


def _round_up(x: int, m: int) -> int:
    return ((x + m - 1) // m) * m


def _cdiv(a: int, b: int) -> int:
    return -(-a // b)


def _pick_vmem_limit() -> int:
    """Generation-aware scoped-VMEM limit (bytes)."""
    cap = None
    try:
        cap = int(pltpu.get_tpu_info().vmem_capacity_bytes)
    except Exception:
        cap = None
    if not cap or cap <= 0:
        cap = 64 * 1024 * 1024        # conservative fallback (v7x per-core)
    limit = (cap * 3) // 4            # leave headroom for compiler scratch
    limit = min(96 * 1024 * 1024, max(32 * 1024 * 1024, limit))
    return min(limit, cap)


def _bf16_compute_supported() -> bool:
    """True on chips with bf16 VPU/EUP (v6e, v7x); False on v2-v5."""
    try:
        kind = jax.devices()[0].device_kind.lower()
    except Exception:
        return True
    for old in ("v2", "v3", "v4", "v5"):
        if old in kind:
            return False
    return True


def _focal_loss_kernel(logits_ref, tgt_ref, out_ref, acc_ref, *,
                       gamma: float, n_valid: int, tm: int,
                       tiles_per_core: int, first_masked_tile: int,
                       needs_mask: bool, bf16_compute: bool):
    # logits_ref: (tm, C) native dtype; tgt_ref: (tm, 1) i32
    # out_ref:    (1, 8, 128) f32 per-core partial-sum slab
    # acc_ref:    (tm, 1) f32 VMEM running per-row accumulator
    core = pl.program_id(0)
    i = pl.program_id(1)
    gtile = core * tiles_per_core + i           # global batch-tile index

    @pl.when(i == 0)
    def _():
        acc_ref[...] = jnp.zeros_like(acc_ref)

    x = logits_ref[...]                          # (tm, C) native dtype
    tgt = tgt_ref[...]                           # (tm, 1) int32
    class_ids = lax.broadcasted_iota(jnp.int32, x.shape, 1)
    onehot = class_ids == tgt                    # (tm, C) bool

    if bf16_compute:
        # Keep the big (tm, C) elementwise work in bf16 (VPU/EUP bf16 on
        # v6e/v7x); accumulate the sum-of-exp and do the (tm, 1) math in f32.
        m = jnp.max(x, axis=-1, keepdims=True)                      # bf16
        e = jnp.exp(x - m)                                          # bf16 EUP
        se = jnp.sum(e.astype(jnp.float32), axis=-1, keepdims=True)
        lse = m.astype(jnp.float32) + jnp.log(se)                   # (tm, 1)
        # One-hot gather: each row sums exactly one non-zero -> exact in bf16.
        tgt_logit = jnp.sum(jnp.where(onehot, x, jnp.zeros_like(x)),
                            axis=-1, keepdims=True).astype(jnp.float32)
    else:
        xf = x.astype(jnp.float32)
        m = jnp.max(xf, axis=-1, keepdims=True)
        lse = m + jnp.log(jnp.sum(jnp.exp(xf - m), axis=-1, keepdims=True))
        tgt_logit = jnp.sum(jnp.where(onehot, xf, 0.0),
                            axis=-1, keepdims=True)

    # F.cross_entropy(..., reduction='none') per example.
    ce = lse - tgt_logit                                            # (tm, 1)

    # Focal weighting: (1 - pt)^gamma * ce, pt = exp(-ce).
    pt = jnp.exp(-ce)
    base = jnp.maximum(1.0 - pt, 0.0)   # clamp: ce can round slightly negative
    g = float(gamma)
    if g == 0.0:
        w = jnp.ones_like(base)
    elif g.is_integer() and 1 <= int(g) <= 8:
        w = base                              # start from base: gamma-1 muls
        for _ in range(int(g) - 1):
            w = w * base
    else:
        w = jnp.power(base, jnp.float32(g))
    focal = w * ce                                                  # (tm, 1)

    # TODO(synk): alpha-weighting path of the PyTorch module relies on
    # integer-dtype truncation of torch.full_like(target, alpha); only the
    # alpha=None path is implemented here.

    # Accumulate into the per-row VMEM vector; mask padded rows only on tiles
    # that actually contain padding.
    if needs_mask:
        is_masked_tile = gtile >= first_masked_tile

        @pl.when(is_masked_tile)
        def _():
            rows = lax.broadcasted_iota(jnp.int32, (tm, 1), 0) + gtile * tm
            acc_ref[...] += jnp.where(rows < n_valid, focal, 0.0)

        @pl.when(jnp.logical_not(is_masked_tile))
        def _():
            acc_ref[...] += focal
    else:
        acc_ref[...] += focal

    # Single reduce-to-scalar + lane-dense output store on the last step.
    @pl.when(i == tiles_per_core - 1)
    def _():
        psum = jnp.sum(acc_ref[...])
        out_ref[...] = jnp.full(out_ref.shape, psum, dtype=out_ref.dtype)


def focal_loss(logits: jax.Array, targets: jax.Array, gamma: float = 2.0,
               *, tile_rows: int | None = None) -> jax.Array:
    """Focal loss forward pass (alpha=None), equivalent to the PyTorch module."""
    n, c = logits.shape
    itemsize = jnp.dtype(logits.dtype).itemsize

    bf16_compute = (logits.dtype == jnp.bfloat16) and _bf16_compute_supported()
    comp_itemsize = 2 if bf16_compute else 4

    # Sublane alignment for the block's second-to-last dim: 8 for 32-bit,
    # 16 for 16-bit inputs.
    row_align = 16 if itemsize == 2 else 8

    # Generation-aware VMEM budget: double-buffered native-dtype input
    # (2*C*itemsize/row) + compute-dtype temporaries (~2*C*comp/row) + iota /
    # one widened transient (~8*C/row) should stay around half of the scoped
    # VMEM limit.
    vmem_limit = _pick_vmem_limit()
    budget = vmem_limit // 2
    per_row_bytes = c * (2 * itemsize + 2 * comp_itemsize + 8) + 16
    tm_cap = max(row_align, budget // per_row_bytes)
    tm_target = 2048 if tile_rows is None else int(tile_rows)
    tm = min(tm_target, tm_cap, _round_up(n, row_align))
    tm = max(row_align, (tm // row_align) * row_align)

    # Batch tiles, split across a leading "parallel" core axis (v7x megacore).
    num_tiles = _cdiv(n, tm)
    num_cores = 2 if num_tiles >= 2 else 1
    tiles_per_core = _cdiv(num_tiles, num_cores)
    num_tiles = num_cores * tiles_per_core
    padded_n = num_tiles * tm

    # Pad batch dim so the grid divides exactly; padded rows are masked in the
    # kernel (only on tiles that contain padding).
    logits_p = logits
    tgt2d = targets.astype(jnp.int32).reshape(n, 1)
    if padded_n != n:
        logits_p = jnp.pad(logits, ((0, padded_n - n), (0, 0)))
        tgt2d = jnp.pad(tgt2d, ((0, padded_n - n), (0, 0)))
    needs_mask = padded_n != n
    first_masked_tile = n // tm

    kernel = functools.partial(
        _focal_loss_kernel,
        gamma=float(gamma),
        n_valid=n,
        tm=tm,
        tiles_per_core=tiles_per_core,
        first_masked_tile=first_masked_tile,
        needs_mask=needs_mask,
        bf16_compute=bf16_compute,
    )

    cost = pl.CostEstimate(
        flops=8 * n * c,
        transcendentals=n * c + 3 * n,
        bytes_accessed=n * c * itemsize + n * 4 + num_cores * 8 * 128 * 4,
    )

    # TODO(synk): for vocab-scale C add a class-axis grid with an online
    # (streaming) logsumexp so tm does not collapse to the sublane minimum.
    out = pl.pallas_call(
        kernel,
        out_shape=jax.ShapeDtypeStruct((num_cores, 8, 128), jnp.float32),
        grid_spec=pltpu.PrefetchScalarGridSpec(
            num_scalar_prefetch=0,
            grid=(num_cores, tiles_per_core),
            in_specs=[
                pl.BlockSpec((tm, c),
                             lambda core, i: (core * tiles_per_core + i, 0)),
                pl.BlockSpec((tm, 1),
                             lambda core, i: (core * tiles_per_core + i, 0)),
            ],
            out_specs=pl.BlockSpec((1, 8, 128), lambda core, i: (core, 0, 0)),
            scratch_shapes=[pltpu.VMEM((tm, 1), jnp.float32)],
        ),
        compiler_params=pltpu.CompilerParams(
            dimension_semantics=("parallel", "arbitrary"),
            vmem_limit_bytes=int(vmem_limit),
        ),
        cost_estimate=cost,
    )(logits_p, tgt2d)

    # Sum the per-core partial sums and apply the mean normalization.
    return jnp.sum(out[:, 0, 0]) * jnp.float32(1.0 / float(n))


def _focal_loss_ref(logits, targets, gamma=2.0):
    """Pure-JAX reference matching F.cross_entropy + focal weighting."""
    logp = jax.nn.log_softmax(logits.astype(jnp.float32), axis=-1)
    ce = -jnp.take_along_axis(logp, targets[:, None].astype(jnp.int32),
                              axis=-1)[:, 0]
    pt = jnp.exp(-ce)
    return jnp.mean((1.0 - pt) ** gamma * ce)


if __name__ == "__main__":
    key = jax.random.PRNGKey(0)
    k_logits, k_tgt = jax.random.split(key)

    # Small (batch, num_classes) shapes consistent with the module.
    N, C = 8, 16
    logits = jax.random.normal(k_logits, (N, C), dtype=jnp.float32)
    targets = jax.random.randint(k_tgt, (N,), 0, C, dtype=jnp.int32)

    loss = focal_loss(logits, targets, gamma=2.0)
    jax.block_until_ready(loss)

    ref = _focal_loss_ref(logits, targets, gamma=2.0)
    assert jnp.allclose(loss, ref, rtol=1e-5, atol=1e-5), (loss, ref)

    # Also exercise bf16 input (native-dtype DMA + bf16 in-kernel compute on
    # v6e/v7x), multiple grid tiles, the 2-core parallel axis, and padded-row
    # masking by forcing a small tile size.
    N2, C2 = 1000, 256
    k2a, k2b = jax.random.split(jax.random.PRNGKey(1))
    logits2 = jax.random.normal(k2a, (N2, C2), dtype=jnp.bfloat16)
    targets2 = jax.random.randint(k2b, (N2,), 0, C2, dtype=jnp.int32)

    loss2 = focal_loss(logits2, targets2, gamma=2.0)          # auto tile size
    jax.block_until_ready(loss2)
    ref2 = _focal_loss_ref(logits2.astype(jnp.float32), targets2, gamma=2.0)
    assert jnp.allclose(loss2, ref2, rtol=2e-3, atol=2e-3), (loss2, ref2)

    loss3 = focal_loss(logits2, targets2, gamma=2.0, tile_rows=256)  # 4 tiles
    jax.block_until_ready(loss3)
    assert jnp.allclose(loss3, ref2, rtol=2e-3, atol=2e-3), (loss3, ref2)

    print("KERNEL_OK")
</pallas_src>

<mosaic_0001>
module attributes {stable_mosaic.version = 11 : i64} {
  func.func @_focal_loss_kernel(%arg0: i32, %arg1: i32, %arg2: memref<8x16xf32, #tpu.memory_space<vmem>>, %arg3: memref<8x1xi32, #tpu.memory_space<vmem>>, %arg4: memref<1x8x128xf32, #tpu.memory_space<vmem>>, %arg5: memref<8x1xf32, #tpu.memory_space<vmem>>) attributes {dimension_semantics = [#tpu.dimension_semantics<parallel>, #tpu.dimension_semantics<arbitrary>], iteration_bounds = array<i64: 1, 1>, scalar_prefetch = 0 : i64, scratch_operands = 1 : i64, tpu.core_type = #tpu.core_type<tc>, window_params = [{transform_indices = @transform_0, window_bounds = array<i64: 8, 16>}, {transform_indices = @transform_1, window_bounds = array<i64: 8, 1>}, {transform_indices = @transform_2, window_bounds = array<i64: 1, 8, 128>}]} {
    %c0_i32 = arith.constant 0 : i32
    %0 = arith.cmpi eq, %arg1, %c0_i32 : i32
    %1 = arith.extui %0 : i1 to i32
    %c0_i32_0 = arith.constant 0 : i32
    %2 = arith.cmpi ne, %1, %c0_i32_0 : i32
    scf.if %2 {
      %cst_16 = arith.constant 0.000000e+00 : f32
      %37 = vector.broadcast %cst_16 : f32 to vector<8x1xf32>
      %c0_17 = arith.constant 0 : index
      %c0_18 = arith.constant 0 : index
      %38 = vector.load %arg5[%c0_17, %c0_18] : memref<8x1xf32, #tpu.memory_space<vmem>>, vector<8x1xf32>
      tpu.vector_store %arg5[%c0_17, %c0_18], %37 {strides = array<i32>} : memref<8x1xf32, #tpu.memory_space<vmem>>, vector<8x1xf32>,
    } else {
    }
    %c0 = arith.constant 0 : index
    %c0_1 = arith.constant 0 : index
    %3 = vector.load %arg2[%c0, %c0_1] : memref<8x16xf32, #tpu.memory_space<vmem>>, vector<8x16xf32>
    %c0_2 = arith.constant 0 : index
    %c0_3 = arith.constant 0 : index
    %4 = vector.load %arg3[%c0_2, %c0_3] : memref<8x1xi32, #tpu.memory_space<vmem>>, vector<8x1xi32>
    %5 = tpu.iota {dimensions = array<i32: 1>} : vector<8x16xi32>
    %6 = vector.broadcast %4 : vector<8x1xi32> to vector<8x16xi32>
    %7 = arith.cmpi eq, %5, %6 : vector<8x16xi32>
    %cst = arith.constant dense<0xFF800000> : vector<8xf32>
    %8 = vector.multi_reduction <maximumf>, %3, %cst [1] : vector<8x16xf32> to vector<8xf32>
    %9 = vector.shape_cast %8 : vector<8xf32> to vector<8x1xf32>
    %10 = vector.broadcast %9 : vector<8x1xf32> to vector<8x16xf32>
    %11 = arith.subf %3, %10 : vector<8x16xf32>
    %12 = math.exp %11 : vector<8x16xf32>
    %cst_4 = arith.constant dense<0.000000e+00> : vector<8xf32>
    %13 = vector.multi_reduction <add>, %12, %cst_4 [1] : vector<8x16xf32> to vector<8xf32>
    %14 = vector.shape_cast %13 : vector<8xf32> to vector<8x1xf32>
    %15 = math.log %14 : vector<8x1xf32>
    %16 = arith.addf %9, %15 : vector<8x1xf32>
    %cst_5 = arith.constant 0.000000e+00 : f32
    %17 = vector.broadcast %cst_5 : f32 to vector<8x16xf32>
    %18 = arith.select %7, %3, %17 : vector<8x16xi1>, vector<8x16xf32>
    %cst_6 = arith.constant dense<0.000000e+00> : vector<8xf32>
    %19 = vector.multi_reduction <add>, %18, %cst_6 [1] : vector<8x16xf32> to vector<8xf32>
    %20 = vector.shape_cast %19 : vector<8xf32> to vector<8x1xf32>
    %21 = arith.subf %16, %20 : vector<8x1xf32>
    %cst_7 = arith.constant 0.000000e+00 : f32
    %22 = vector.broadcast %cst_7 : f32 to vector<8x1xf32>
    %23 = arith.subf %22, %21 : vector<8x1xf32>
    %24 = math.exp %23 : vector<8x1xf32>
    %cst_8 = arith.constant 1.000000e+00 : f32
    %25 = vector.broadcast %cst_8 : f32 to vector<8x1xf32>
    %26 = arith.subf %25, %24 : vector<8x1xf32>
    %cst_9 = arith.constant 0.000000e+00 : f32
    %27 = vector.broadcast %cst_9 : f32 to vector<8x1xf32>
    %28 = arith.maximumf %26, %27 : vector<8x1xf32>
    %29 = arith.mulf %28, %28 : vector<8x1xf32>
    %30 = arith.mulf %29, %21 : vector<8x1xf32>
    %c0_10 = arith.constant 0 : index
    %c0_11 = arith.constant 0 : index
    %31 = vector.load %arg5[%c0_10, %c0_11] : memref<8x1xf32, #tpu.memory_space<vmem>>, vector<8x1xf32>
    %32 = arith.addf %31, %30 : vector<8x1xf32>
    %c0_12 = arith.constant 0 : index
    %c0_13 = arith.constant 0 : index
    %33 = vector.load %arg5[%c0_12, %c0_13] : memref<8x1xf32, #tpu.memory_space<vmem>>, vector<8x1xf32>
    tpu.vector_store %arg5[%c0_12, %c0_13], %32 {strides = array<i32>} : memref<8x1xf32, #tpu.memory_space<vmem>>, vector<8x1xf32>,
    %c0_i32_14 = arith.constant 0 : i32
    %34 = arith.cmpi eq, %arg1, %c0_i32_14 : i32
    %35 = arith.extui %34 : i1 to i32
    %c0_i32_15 = arith.constant 0 : i32
    %36 = arith.cmpi ne, %35, %c0_i32_15 : i32
    scf.if %36 {
      %c0_16 = arith.constant 0 : index
      %c0_17 = arith.constant 0 : index
      %37 = vector.load %arg5[%c0_16, %c0_17] : memref<8x1xf32, #tpu.memory_space<vmem>>, vector<8x1xf32>
      %38 = vector.shape_cast %37 : vector<8x1xf32> to vector<1x8x1xf32>
      %cst_18 = arith.constant dense<0.000000e+00> : vector<1xf32>
      %39 = vector.multi_reduction <add>, %38, %cst_18 [1, 2] : vector<1x8x1xf32> to vector<1xf32>
      %40 = vector.shape_cast %39 : vector<1xf32> to vector<1x1x1xf32>
      %41 = vector.extract %40[0, 0, 0] : f32 from vector<1x1x1xf32>
      %42 = vector.broadcast %41 : f32 to vector<1x8x128xf32>
      %c0_19 = arith.constant 0 : index
      %c0_20 = arith.constant 0 : index
      %c0_21 = arith.constant 0 : index
      %43 = vector.load %arg4[%c0_19, %c0_20, %c0_21] : memref<1x8x128xf32, #tpu.memory_space<vmem>>, vector<1x8x128xf32>
      tpu.vector_store %arg4[%c0_19, %c0_20, %c0_21], %42 {strides = array<i32>} : memref<1x8x128xf32, #tpu.memory_space<vmem>>, vector<1x8x128xf32>,
    } else {
    }
    return
  }
  func.func @transform_0(%arg0: i32, %arg1: i32) -> (i32, i32) {
    %c1_i32 = arith.constant 1 : i32
    %0 = arith.muli %arg0, %c1_i32 : i32
    %1 = arith.addi %0, %arg1 : i32
    %c0_i32 = arith.constant 0 : i32
    %c0_i32_0 = arith.constant 0 : i32
    return %1, %c0_i32 : i32, i32
  }
  func.func @transform_1(%arg0: i32, %arg1: i32) -> (i32, i32) {
    %c1_i32 = arith.constant 1 : i32
    %0 = arith.muli %arg0, %c1_i32 : i32
    %1 = arith.addi %0, %arg1 : i32
    %c0_i32 = arith.constant 0 : i32
    %c0_i32_0 = arith.constant 0 : i32
    return %1, %c0_i32 : i32, i32
  }
  func.func @transform_2(%arg0: i32, %arg1: i32) -> (i32, i32, i32) {
    %c0_i32 = arith.constant 0 : i32
    %c0_i32_0 = arith.constant 0 : i32
    %c0_i32_1 = arith.constant 0 : i32
    return %arg0, %c0_i32, %c0_i32_0 : i32, i32, i32
  }
}

</mosaic_0001>

<bundles_post_ra>
// kernel: tpu_custom_call.1
= control target key start
LH: loop header
LB: loop body
LE: loop exit
PB: predicated region body
PF: predicated region fallthrough
CT: control target
= control target key end

     0   :  { %vm60_vm0 = vcmask 130048   ;;  %s209_s0 = inlined_call_operand.vmem [shape: f32[8,16], index: 0, kind: input, shape index: {}]   ;;  %s210_s1 = inlined_call_operand.vmem [shape: s32[8,1], index: 1, kind: input, shape index: {}]   ;;  %s211_s2 = inlined_call_operand.hbm [shape: f32[1,8,128], index: 2, kind: output, shape index: {}]  }
   0x1   :  { %v52_v0 = vld [vmem:[%s209_s0] sm:$0xff] }
   0x2   :  { %7 = vsyncpa [#allocation4], 0  ;;  %v61_v1 = vsel %vm60_vm0, %v52_v0, -inf  ;;  %v167_v2 = vmov 0   ;;  %v53_v3 = vld [vmem:[%s210_s1] sm:$0xff]  ;;  %v54_v7 = vlaneseq  ;;  %vm50_vm2 = vcmask 7168  }
   0x3   :  { %136 = vset.pattern.permute.xlu0 %v167_v2  ;;  %v168_v14 = vmov 0.0   ;;  %s169_s0 = smov [#allocation3]  }
   0x4   :  { %62 = vmax.xlane.f32.xlu0 %v61_v1  ;;  %v55_v8 = vand.u32 127, %v54_v7  ;;  %51 = vst.msk [vmem:[#allocation2] sm:$0xff] %vm50_vm2, %v168_v14  ;;  %s111_s1 = sshll.u32 %s169_s0, 4  ;;  %s112_s1 = int_to_ptr.vmem [resolvable:$true] %s111_s1 }
   0x5   :  { %s143_s14 = scalar_lea.vmem %s112_s1, 128  ;;  %p148_p1 = scmp.lt.s32.totalorder %s112_s1, %s112_s1 }
   0x6   :  { %p144_p0 = scmp.ne.s32.totalorder %s112_s1, %s143_s14  ;;  %p149_p2 = scmp.lt.s32.totalorder %s143_s14, %s143_s14 }
   0x8   :  { %p150_p3 = por %p149_p2, %p148_p1 }
   0xa   :  { %p151_p4 = pnand %p150_p3, %p144_p0 }
   0xb   :  { %v85_v27 = vld [vmem:[#allocation2] sm:$0xff] }
  0x1a   :  { %57 = vperm.xlu0 %136, %v53_v3  }
  0x91   :  { %v63_v4 = vpop.xlane.xlu0 %62 }
  0x92   :  { %v64_v5 = vsub.f32 %v52_v0, %v63_v4 }
  0x94   :  { %v65_v6 = vmul.f32 1.442695, %v64_v5 }
  0x96   :  { %137 = vpow2.f32 %v65_v6 }
  0x99   :  { %v58_v9 = vpop.permute.xlu0 %57 }
  0x9a   :  { %vm59_vm1 = vcmp.eq.s32.totalorder %v55_v8, %v58_v9 }
  0x9b   :  { %v73_v11 = vsel %vm59_vm1, %v52_v0, 0.0 }
  0x9c   :  { %v74_v13 = vsel %vm60_vm0, %v73_v11, 0.0 }
  0xa0   :  { %v138_v10 = vpop.eup %137 }
  0xa1   :  { %v67_v12 = vsel %vm60_vm0, %v138_v10, 0.0 }
  0xa2   :  { %68 = vadd.xlane.f32.xlu1 %v67_v12 }
  0xa6   :  { %75 = vadd.xlane.f32.xlu1 %v74_v13 }
 0x12f   :  { %v69_v15 = vpop.xlane.xlu1 %68 }
 0x130   :  { %139 = vlog2.f32 %v69_v15 }
 0x133   :  { %v76_v18 = vpop.xlane.xlu1 %75 }
 0x13a   :  { %v140_v16 = vpop.eup %139 }
 0x13b   :  { %v71_v17 = vmul.f32 0.6931472, %v140_v16 }
 0x13d   :  { %v72_v19 = vadd.f32 %v71_v17, %v63_v4 }
 0x13f   :  { %v77_v20 = vsub.f32 %v72_v19, %v76_v18 }
 0x141   :  { %v78_v21 = vsub.f32 0.0, %v77_v20 }
 0x143   :  { %v79_v22 = vmul.f32 1.442695, %v78_v21 }
 0x145   :  { %141 = vpow2.f32 %v79_v22 }
 0x14f   :  { %v142_v23 = vpop.eup %141 }
 0x150   :  { %v81_v24 = vsub.f32 1.0, %v142_v23 }
 0x152   :  { %v82_v25 = vmax.f32 %v81_v24, 0.0 }
 0x154   :  { %v83_v26 = vmul.f32 %v82_v25, %v82_v25 }
 0x156   :  { %v84_v28 = vmul.f32 %v83_v26, %v77_v20 }
 0x158   :  { %v86_v29 = vadd.f32 %v85_v27, %v84_v28 }
 0x15a   :  { %88 = vst.msk [vmem:[#allocation2] sm:$0xff] %vm50_vm2, %v86_v29 }
 0x161   :  { %v92_v30 = vld [vmem:[#allocation2] sm:$0xff] }
 0x162   :  { %v93_v31 = vsel %vm50_vm2, %v92_v30, 0.0 }
 0x163   :  { %94 = vadd.xlane.f32.xlu1 %v93_v31 }
 0x1f0   :  { %v95_v32 = vpop.xlane.xlu1 %94 }
 0x1f1   :  { %v96_v33 = vrot.slane %v95_v32, 4 }
 0x1f3   :  { %v97_v34 = vadd.f32 %v96_v33, %v95_v32 }
 0x1f5   :  { %v98_v35 = vrot.slane %v97_v34, 2 }
 0x1f7   :  { %v99_v36 = vadd.f32 %v98_v35, %v97_v34 }
 0x1f9   :  { %v100_v37 = vrot.slane %v99_v36, 1 }
 0x1fb   :  { %v101_v38 = vadd.f32 %v100_v37, %v99_v36 }
 0x1fd   :  { %131 = vpush %v101_v38 }
 0x22e   :  { %s132_s13 = spop %131 }
 0x22f   :  { %v103_v39 = vstv %s132_s13 }
 0x230   :  { %104 = vst [vmem:[#allocation3] sm:$0xff] %v103_v39 }
 0x231   :  { %154 = shalt.err (!%p151_p4)
}
 0x232   :  { %s155_s17 = scalar_lea.hbm %s211_s2, 128 }
 0x233   :  { %p156_p5 = scmp.ne.s32.totalorder %s211_s2, %s155_s17  ;;  %p159_p6 = scmp.lt.u32.totalorder %s155_s17, %s211_s2 }
 0x235   :  { %p161_p7 = pnand %p159_p6, %p156_p5 }
 0x237   :  { %164 = shalt.err (!%p161_p7)
}
 0x238   :  { %114 = dma.vmem_to_hbm [thread:$0]  %s112_s1, 128, %s211_s2, [#allocation4]  }
 0x239   :  { %165 = dma.done.wait [#allocation4], 128  }
 0x23a   :  { %166 = vsyncadd [#allocation4], 4294967168 }
 0x23b   :  { %118 = vsyncpa [#allocation4], 1 }

</bundles_post_ra>
